<compile_context>
chip_gen: v6e
topology: v6e:2x2x1
jax: 0.10.0
libtpu: 0.0.40
codegen_flags: <defaults>
</compile_context>

<pallas_src>
import functools
import math

import jax
import jax.numpy as jnp
from jax.experimental import pallas as pl
from jax.experimental.pallas import tpu as pltpu


def _self_attention_kernel(x_ref, wqkv_ref, bqkv_ref, o_ref, *, bb, seq, dim):
    """One grid step: bb batches, each (seq, dim).

    x_ref:    (bb*seq, dim)  bf16
    wqkv_ref: (dim, 3*dim)   bf16   [Wq^T/scale | Wk^T | Wv^T]
    bqkv_ref: (1, 3*dim)     f32    [bq/scale   | bk   | bv  ]
    o_ref:    (bb*seq, dim)  f32
    """
    rows = bb * seq

    # Fused QKV projection: one tall bf16 MXU matmul, f32 accumulation + bias.
    qkv = jnp.dot(x_ref[...], wqkv_ref[...],
                  preferred_element_type=jnp.float32) + bqkv_ref[...]

    # Leading-dim split only (lane dim untouched) -> layout-trivial.
    qkv = qkv.reshape(bb, seq, 3 * dim)

    # q/k/v lane slices + bf16 casts done ONCE per grid step (hoisted out of
    # any per-batch work), not bb*3 times.
    q = qkv[:, :, 0 * dim:1 * dim].astype(jnp.bfloat16)
    k = qkv[:, :, 1 * dim:2 * dim].astype(jnp.bfloat16)
    v = qkv[:, :, 2 * dim:3 * dim].astype(jnp.bfloat16)

    # Batched scores: one MXU dot_general with batch dims instead of bb tiny
    # ones. The 1/sqrt(D) scale is already folded into the q-side weights.
    scores = jnp.einsum("bqd,bkd->bqk", q, k,
                        preferred_element_type=jnp.float32)       # (bb,Sq,Sk)

    # torch.softmax(scores, dim=1): normalize over the QUERY axis, i.e. axis=1
    # of the (bb, Sq, Sk) scores.
    m = jnp.max(scores, axis=1, keepdims=True)
    e = jnp.exp(scores - m)
    denom = jnp.sum(e, axis=1, keepdims=True)
    attn = e * pl.reciprocal(denom, approx=True)                  # EUP slot

    out = jnp.einsum("bqk,bkd->bqd", attn.astype(jnp.bfloat16), v,
                     preferred_element_type=jnp.float32)          # (bb,S,D)

    # Single full-block store per grid step (no per-batch masked stores).
    # TODO(synk): a lane-dense (bb, S*D) out_spec would need a sublane->lane
    # repack that Mosaic may reject at D=32; kept the safe (bb*S, D) store.
    o_ref[...] = out.reshape(rows, dim).astype(o_ref.dtype)


def _vmem_scoped_limit_bytes():
    """Generation-aware scoped-VMEM target (~75% of physical, capped 96 MiB)."""
    try:
        cap = int(pltpu.get_tpu_info().vmem_capacity_bytes)
    except Exception:
        cap = 64 * 1024 * 1024            # conservative: v7x per-TC VMEM
    return min((cap * 3) // 4, 96 * 1024 * 1024)


def _pick_block_b(batch, seq, dim, *, vmem_budget, target_rows=256,
                  min_grid_steps=2):
    """Batches per grid step: tall MXU LHS, VMEM-safe, >= 2 parallel steps."""
    per_batch = (2 * seq * dim * 2          # double-buffered x block (bf16)
                 + 2 * seq * dim * 4        # double-buffered out block (f32)
                 + seq * 3 * dim * 4        # qkv (f32)
                 + 3 * seq * dim * 2        # q/k/v bf16 copies
                 + 3 * seq * seq * 4        # scores / exp / attn (f32)
                 + seq * dim * 4)           # out value (f32)
    fit = max(1, int(vmem_budget) // max(per_batch, 1))
    want = max(1, -(-target_rows // seq))   # ceil: bb*seq >= target_rows
    bb = max(1, min(batch, want, fit))
    while batch % bb:                       # exact grid (no partial blocks)
        bb -= 1
    # Keep >= min_grid_steps so both v7x TensorCores get work on the
    # "parallel" grid axis; free on single-TC chips (v5e/v6e).
    while bb > 1 and batch // bb < min_grid_steps:
        bb -= 1
        while batch % bb:
            bb -= 1
    # (8,128) rule: sublane extent of the block must be a multiple of 8 or
    # span the full array.
    if (bb * seq) % 8 != 0 and bb != batch:
        bb = batch
    return bb


def self_attention(x, wq, wk, wv, bq, bk, bv, *, block_b=None):
    """x: (B, S, D). wq/wk/wv: torch nn.Linear weights (D, D): y = x @ W^T + b."""
    B, S, D = x.shape
    inv_scale = 1.0 / math.sqrt(float(D))

    # Fold 1/sqrt(D) into the query projection, fuse the three projections
    # into one (D, 3D) weight / (1, 3D) bias, feed the MXU bf16 operands
    # (accumulation stays f32 inside the kernel).
    w_qkv = jnp.concatenate([wq.T * inv_scale, wk.T, wv.T], axis=1)
    w_qkv = w_qkv.astype(jnp.bfloat16)
    b_qkv = jnp.concatenate([bq * inv_scale, bk, bv]).reshape(1, 3 * D)
    b_qkv = b_qkv.astype(jnp.float32)

    scoped_vmem = _vmem_scoped_limit_bytes()
    w_resident = 2 * (D * 3 * D * 2 + 3 * D * 4)   # double-buffered W + bias
    if block_b is None:
        bb = _pick_block_b(B, S, D,
                           vmem_budget=max(scoped_vmem - w_resident, 1 << 20))
    else:
        bb = block_b

    x2 = x.reshape(B * S, D).astype(jnp.bfloat16)
    kernel = functools.partial(_self_attention_kernel, bb=bb, seq=S, dim=D)

    # Keep only a single resident copy of the constant fused weights once they
    # are big enough to matter (>= 4 MiB); negligible / skipped at tiny D.
    w_kwargs = {}
    if D * 3 * D * 2 >= (4 << 20):
        w_kwargs = dict(pipeline_mode=pl.Buffered(1))

    cost = pl.CostEstimate(
        flops=2 * B * S * D * (3 * D) + 4 * B * S * S * D,
        transcendentals=B * S * S,
        bytes_accessed=(B * S * D * 2          # x (bf16)
                        + D * 3 * D * 2        # fused W (bf16)
                        + 3 * D * 4            # fused bias (f32)
                        + B * S * D * 4),      # out (f32)
    )

    out = pl.pallas_call(
        kernel,
        out_shape=jax.ShapeDtypeStruct((B * S, D), jnp.float32),
        grid_spec=pltpu.PrefetchScalarGridSpec(
            num_scalar_prefetch=0,
            grid=(B // bb,),
            in_specs=[
                pl.BlockSpec((bb * S, D), lambda i: (i, 0)),              # x
                pl.BlockSpec((D, 3 * D), lambda i: (0, 0), **w_kwargs),   # W
                pl.BlockSpec((1, 3 * D), lambda i: (0, 0)),               # b
            ],
            out_specs=pl.BlockSpec((bb * S, D), lambda i: (i, 0)),
        ),
        compiler_params=pltpu.CompilerParams(
            dimension_semantics=("parallel",),
            vmem_limit_bytes=scoped_vmem),
        cost_estimate=cost,
    )(x2, w_qkv, b_qkv)

    # TODO(synk): K/N tiling of the fused QKV matmul (reduction grid axis with
    # an f32 VMEM accumulator) is needed once D reaches ~1-2K; not implemented.
    return out.reshape(B, S, D).astype(x.dtype)


def _reference(x, wq, wk, wv, bq, bk, bv):
    D = x.shape[-1]
    scale = jnp.sqrt(jnp.float32(D))
    q = x @ wq.T + bq
    k = x @ wk.T + bk
    v = x @ wv.T + bv
    scores = jnp.einsum("bqd,bkd->bqk", q, k / scale)
    attn = jax.nn.softmax(scores, axis=1)   # torch dim=1 (query axis)
    return jnp.einsum("bqk,bkd->bqd", attn, v)


if __name__ == "__main__":
    B, S, D = 2, 8, 32
    key = jax.random.PRNGKey(0)
    kx, kq, kk, kv, kbq, kbk, kbv = jax.random.split(key, 7)

    x = jax.random.normal(kx, (B, S, D), dtype=jnp.float32)
    # Deterministic parameter init (PyTorch-shape weights: (dim, dim), bias: (dim,))
    bound = 1.0 / math.sqrt(D)
    wq = jax.random.uniform(kq, (D, D), jnp.float32, -bound, bound)
    wk = jax.random.uniform(kk, (D, D), jnp.float32, -bound, bound)
    wv = jax.random.uniform(kv, (D, D), jnp.float32, -bound, bound)
    bq = jax.random.uniform(kbq, (D,), jnp.float32, -bound, bound)
    bk = jax.random.uniform(kbk, (D,), jnp.float32, -bound, bound)
    bv = jax.random.uniform(kbv, (D,), jnp.float32, -bound, bound)

    out = self_attention(x, wq, wk, wv, bq, bk, bv)
    out = jax.block_until_ready(out)

    ref = _reference(x, wq, wk, wv, bq, bk, bv)
    # bf16 MXU inputs + approx reciprocal -> relaxed tolerance vs f32 reference.
    assert jnp.allclose(out, ref, atol=2e-2, rtol=2e-2), "mismatch vs reference"

    print("KERNEL_OK")
</pallas_src>

<mosaic_0001>
module attributes {stable_mosaic.version = 11 : i64} {
  func.func @_self_attention_kernel(%arg0: i32, %arg1: memref<8x32xbf16, #tpu.memory_space<vmem>>, %arg2: memref<32x96xbf16, #tpu.memory_space<vmem>>, %arg3: memref<1x96xf32, #tpu.memory_space<vmem>>, %arg4: memref<8x32xf32, #tpu.memory_space<vmem>>) attributes {dimension_semantics = [#tpu.dimension_semantics<parallel>], iteration_bounds = array<i64: 2>, scalar_prefetch = 0 : i64, scratch_operands = 0 : i64, tpu.core_type = #tpu.core_type<tc>, window_params = [{transform_indices = @transform_0, window_bounds = array<i64: 8, 32>}, {pipeline_mode = #tpu.pipeline_mode<synchronous>, transform_indices = @transform_1, window_bounds = array<i64: 32, 96>}, {pipeline_mode = #tpu.pipeline_mode<synchronous>, transform_indices = @transform_2, window_bounds = array<i64: 1, 96>}, {transform_indices = @transform_3, window_bounds = array<i64: 8, 32>}]} {
    %c0 = arith.constant 0 : index
    %c0_0 = arith.constant 0 : index
    %0 = vector.load %arg1[%c0, %c0_0] : memref<8x32xbf16, #tpu.memory_space<vmem>>, vector<8x32xbf16>
    %c0_1 = arith.constant 0 : index
    %c0_2 = arith.constant 0 : index
    %1 = vector.load %arg2[%c0_1, %c0_2] : memref<32x96xbf16, #tpu.memory_space<vmem>>, vector<32x96xbf16>
    %cst = arith.constant dense<0.000000e+00> : vector<8x96xf32>
    %2 = tpu.matmul %0, %1, %cst {dimension_numbers = #tpu.dot_dimension_numbers<[1], [0], [0], [1], [0, 0, 1, 1], [], []>} : vector<8x32xbf16>, vector<32x96xbf16>, vector<8x96xf32> -> vector<8x96xf32>
    %c0_3 = arith.constant 0 : index
    %c0_4 = arith.constant 0 : index
    %3 = vector.load %arg3[%c0_3, %c0_4] : memref<1x96xf32, #tpu.memory_space<vmem>>, vector<1x96xf32>
    %4 = vector.broadcast %3 : vector<1x96xf32> to vector<8x96xf32>
    %5 = arith.addf %2, %4 : vector<8x96xf32>
    %6 = vector.shape_cast %5 : vector<8x96xf32> to vector<1x8x96xf32>
    %7 = vector.extract_strided_slice %6 {offsets = [0, 0, 0], sizes = [1, 8, 32], strides = [1, 1, 1]} : vector<1x8x96xf32> to vector<1x8x32xf32>
    %8 = arith.truncf %7 : vector<1x8x32xf32> to vector<1x8x32xbf16>
    %9 = vector.extract_strided_slice %6 {offsets = [0, 0, 32], sizes = [1, 8, 32], strides = [1, 1, 1]} : vector<1x8x96xf32> to vector<1x8x32xf32>
    %10 = arith.truncf %9 : vector<1x8x32xf32> to vector<1x8x32xbf16>
    %11 = vector.extract_strided_slice %6 {offsets = [0, 0, 64], sizes = [1, 8, 32], strides = [1, 1, 1]} : vector<1x8x96xf32> to vector<1x8x32xf32>
    %12 = arith.truncf %11 : vector<1x8x32xf32> to vector<1x8x32xbf16>
    "tpu.trace_start"() <{level = 10 : i32, message = "bqd,bkd->bqk"}> : () -> ()
    %cst_5 = arith.constant dense<0.000000e+00> : vector<1x8x8xf32>
    %13 = tpu.matmul %8, %10, %cst_5 {dimension_numbers = #tpu.dot_dimension_numbers<[2], [2], [1], [1], [0, 0, 0, 1, 1, 1], [0], [0]>} : vector<1x8x32xbf16>, vector<1x8x32xbf16>, vector<1x8x8xf32> -> vector<1x8x8xf32>
    "tpu.trace_stop"() : () -> ()
    %cst_6 = arith.constant dense<0xFF800000> : vector<1x8xf32>
    %14 = vector.multi_reduction <maximumf>, %13, %cst_6 [1] : vector<1x8x8xf32> to vector<1x8xf32>
    %15 = vector.shape_cast %14 : vector<1x8xf32> to vector<1x1x8xf32>
    %16 = vector.broadcast %15 : vector<1x1x8xf32> to vector<1x8x8xf32>
    %17 = arith.subf %13, %16 : vector<1x8x8xf32>
    %18 = math.exp %17 : vector<1x8x8xf32>
    %cst_7 = arith.constant dense<0.000000e+00> : vector<1x8xf32>
    %19 = vector.multi_reduction <add>, %18, %cst_7 [1] : vector<1x8x8xf32> to vector<1x8xf32>
    %20 = vector.shape_cast %19 : vector<1x8xf32> to vector<1x1x8xf32>
    %21 = tpu.reciprocal %20 {approx = true} : vector<1x1x8xf32> -> vector<1x1x8xf32>
    %22 = vector.broadcast %21 : vector<1x1x8xf32> to vector<1x8x8xf32>
    %23 = arith.mulf %18, %22 : vector<1x8x8xf32>
    %24 = arith.truncf %23 : vector<1x8x8xf32> to vector<1x8x8xbf16>
    "tpu.trace_start"() <{level = 10 : i32, message = "bqk,bkd->bqd"}> : () -> ()
    %cst_8 = arith.constant dense<0.000000e+00> : vector<1x8x32xf32>
    %25 = tpu.matmul %24, %12, %cst_8 {dimension_numbers = #tpu.dot_dimension_numbers<[2], [1], [1], [2], [0, 0, 0, 1, 1, 2], [0], [0]>} : vector<1x8x8xbf16>, vector<1x8x32xbf16>, vector<1x8x32xf32> -> vector<1x8x32xf32>
    "tpu.trace_stop"() : () -> ()
    %26 = vector.shape_cast %25 : vector<1x8x32xf32> to vector<8x32xf32>
    %c0_9 = arith.constant 0 : index
    %c0_10 = arith.constant 0 : index
    %27 = vector.load %arg4[%c0_9, %c0_10] : memref<8x32xf32, #tpu.memory_space<vmem>>, vector<8x32xf32>
    tpu.vector_store %arg4[%c0_9, %c0_10], %26 {strides = array<i32>} : memref<8x32xf32, #tpu.memory_space<vmem>>, vector<8x32xf32>,
    return
  }
  func.func @transform_0(%arg0: i32) -> (i32, i32) {
    %c0_i32 = arith.constant 0 : i32
    %c0_i32_0 = arith.constant 0 : i32
    return %arg0, %c0_i32 : i32, i32
  }
  func.func @transform_1(%arg0: i32) -> (i32, i32) {
    %c0_i32 = arith.constant 0 : i32
    %c0_i32_0 = arith.constant 0 : i32
    %c0_i32_1 = arith.constant 0 : i32
    return %c0_i32, %c0_i32_0 : i32, i32
  }
  func.func @transform_2(%arg0: i32) -> (i32, i32) {
    %c0_i32 = arith.constant 0 : i32
    %c0_i32_0 = arith.constant 0 : i32
    %c0_i32_1 = arith.constant 0 : i32
    return %c0_i32, %c0_i32_0 : i32, i32
  }
  func.func @transform_3(%arg0: i32) -> (i32, i32) {
    %c0_i32 = arith.constant 0 : i32
    %c0_i32_0 = arith.constant 0 : i32
    return %arg0, %c0_i32 : i32, i32
  }
}

</mosaic_0001>

<bundles_post_ra>
// kernel: tpu_custom_call.1
= control target key start
LH: loop header
LB: loop body
LE: loop exit
PB: predicated region body
PF: predicated region fallthrough
CT: control target
= control target key end

     0   :  { %8 = vsyncpa [#allocation3], 0  ;;  %s931_s0 = inlined_call_operand.hbm [shape: bf16[16,32], index: 0, kind: input, shape index: {}]   ;;  %s932_s1 = inlined_call_operand.hbm [shape: bf16[32,96], index: 1, kind: input, shape index: {}]   ;;  %s933_s2 = inlined_call_operand.vmem [shape: f32[1,96], index: 2, kind: input, shape index: {}]   ;;  %s934_s3 = inlined_call_operand.hbm [shape: f32[16,32], index: 3, kind: output, shape index: {}]  }
   0x1   :  { %10 = vsyncpa [#allocation3 + $0x1], 0 }
   0x2   :  { %11 = vsyncpa [#allocation6], 0 }
   0x3   :  { %12 = vsyncpa [#allocation4], 0 }
   0x4   :  { %14 = vsyncpa [#allocation4 + $0x1], 0  ;;  %s754_s12 = smov 0   ;;  %s756_s13 = smov 0  }
   0x5   :  { %s758_s14 = smov 0   ;;  %s760_s15 = smov 0  }
   0x6 LB: > { %s775_s16 = sadd.s32 4294967295, %s723_s15   ;;  %s485_s17 = sadd.s32 4294967294, %s723_s15   ;;  %s723_s15 = sphi %s760_s15, %s956_s15   ;;  %s719_s14 = sphi %s758_s14, %s955_s14   ;;  %s715_s13 = sphi %s756_s13, %s954_s13   ;;  %s711_s12 = sphi %s754_s12, %s953_s12  }
   0x7   : > { %p40_p0 = scmp.ne.s32.totalorder %s715_s13, %s711_s12  ;;  %p935_p1 = scmp.eq.s32.totalorder %s775_s16, 0 }
   0x8   : > { %p112_p3 = scmp.eq.s32.totalorder %s485_s17, 1  ;;  %p486_p5 = scmp.ge.s32.totalorder %s723_s15, 1 }
   0x9   : > { %p784_p4 = por %p935_p1, %p40_p0  ;;  %p119_p7 = scmp.lt.s32.totalorder %s723_s15, 3 }
   0xa   : > { %p789_p6 = por %p112_p3, %p40_p0  ;;  %s725_s21 = smov [#allocation5]  }
   0xb   : > { %s939_s18 = scalar_select %p784_p4, 1, 0 }
   0xc   : > { %s940_s19 = scalar_select %p789_p6, 1, 0 }
   0xd   : > { %p794_p8 = pnand %p486_p5, %p119_p7  ;;  %s131_s22 = sshll.u32 %s725_s21, 4  ;;  %s132_s22 = int_to_ptr.vmem [resolvable:$true] %s131_s22 }
   0xe   : > { %s808_s24 = sadd.s32 1, %s723_s15   ;;  %s27_s25 = sadd.s32 1, %s719_s14 }
   0xf   : > { %s941_s20 = scalar_select %p794_p8, 1, 0 }
  0x10   : > { %p540_p9 = pneg %p794_p8  ;;  %s24_s26 = ssub.s32 %s723_s15, %s808_s24 }
  0x11   : > { %s612_s27 = scalar_lea.vmem %s132_s22, 256  ;;  %p620_p5 = scmp.lt.s32.totalorder %s132_s22, %s132_s22 }
  0x12   : > { %p803_p11 = pnand %p540_p9, %p935_p1  ;;  %p613_p13 = scmp.ne.s32.totalorder %s132_s22, %s612_s27 }
  0x13   : > { %p621_p7 = scmp.lt.s32.totalorder %s612_s27, %s612_s27 }
  0x14   : > { %p603_p12 = pneg %p803_p11 }
  0x15   : > { %p622_p10 = por %p621_p7, %p620_p5 }
  0x16   : > { %p615_p0 = pnand %p613_p13, %p603_p12 }
  0x18   : > { %p616_p3 = pneg %p615_p0 }
  0x1a   : > { %p623_p2 = pnand %p622_p10, %p616_p3 }
  0x1c   : > { %626 = shalt.err (!%p623_p2)
}
  0x1d   : > { %s726_s28 = smov 64   ;;  %s727_s29 = smov 4  }
  0x1e   : > { %543 = dma.hbm_to_vmem [thread:$0]  (!%p803_p11), %s932_s1, 256, %s132_s22, [#allocation6], %s726_s28, %s726_s28, %s727_s29  }
  0x1f   : > { %p25_p9 = scmp.eq.s32.totalorder %s24_s26, 0  ;;  %p34_p12 = scmp.ne.s32.totalorder %s719_s14, %s715_s13 }
  0x20   : > { %p35_p10 = scmp.eq.s32.totalorder %s723_s15, 0  ;;  %p553_p2 = scmp.lt.s32.totalorder %s723_s15, 2 }
  0x21   : > { %s825_s5 = scalar_select %p25_p9, %s719_s14, %s27_s25  }
  0x22   : > { %p36_p13 = por %p35_p10, %p34_p12  ;;  %p943_p0 = scmp.eq.s32.totalorder %s775_s16, 1 }
  0x23   : > { %s148_s7 = sand.u32 1, %s719_s14   ;;  %s490_s8 = sshll.u32 %s723_s15, 6 }
  0x24   : > { %p829_p3 = por %p943_p0, %p34_p12  ;;  %s489_s9 = sshll.u32 %s148_s7, 2 }
  0x25   : > { %s838_s17 = scalar_lea.hbm %s931_s0, %s490_s8  ;;  %s152_s21 = scalar_lea.vmem [#allocation2], %s489_s9 }
  0x26   : > { %s944_s6 = scalar_select %p829_p3, 1, 0 }
  0x27   : > { %s159_s22 = sshll.u32 %s152_s21, 4  ;;  %p840_p11 = pnand %p553_p2, %p36_p13  ;;  %s160_s22 = int_to_ptr.vmem [resolvable:$true] %s159_s22 }
  0x28   : > { %s149_s25 = scalar_lea.sflag [#allocation3], %s148_s7  ;;  %s627_s26 = scalar_lea.hbm %s838_s17, 64 }
  0x29   : > { %p628_p5 = scmp.ne.s32.totalorder %s838_s17, %s627_s26  ;;  %p629_p7 = pneg %p840_p11 }
  0x2a   : > { %s632_s29 = scalar_lea.hbm %s931_s0, 128  ;;  %p633_p10 = scmp.lt.s32.totalorder %s838_s17, %s931_s0 }
  0x2b   : > { %p630_p9 = pnand %p629_p7, %p628_p5  ;;  %p634_p2 = scmp.lt.s32.totalorder %s632_s29, %s627_s26 }
  0x2d   : > { %p631_p12 = pneg %p630_p9  ;;  %p635_p13 = por %p634_p2, %p633_p10 }
  0x2f   : > { %p636_p0 = pnand %p635_p13, %p631_p12 }
  0x31   : > { %639 = shalt.err (!%p636_p0)
}
  0x32   : > { %s640_s8 = scalar_lea.vmem %s160_s22, 64  ;;  %s728_s7 = smov [#allocation2]  }
  0x33   : > { %p641_p1 = scmp.ne.s32.totalorder %s160_s22, %s640_s8  ;;  %s645_s9 = sshll.u32 %s728_s7, 4  ;;  %s646_s9 = int_to_ptr.vmem [resolvable:$false] %s645_s9 }
  0x34   : > { %s647_s10 = scalar_lea.vmem %s646_s9, 128  ;;  %p648_p5 = scmp.lt.s32.totalorder %s160_s22, %s646_s9 }
  0x35   : > { %p643_p6 = pnand %p641_p1, %p629_p7  ;;  %p649_p9 = scmp.lt.s32.totalorder %s647_s10, %s640_s8 }
  0x37   : > { %p644_p3 = pneg %p643_p6  ;;  %p650_p4 = por %p649_p9, %p648_p5 }
  0x39   : > { %p651_p8 = pnand %p650_p4, %p644_p3 }
  0x3b   : > { %654 = shalt.err (!%p651_p8)
}
  0x3c   : > { %547 = dma.hbm_to_vmem [thread:$0]  (!%p840_p11), %s838_s17, 64, %s160_s22, %s149_s25  }
  0x3d   : > { %p946_p12 = scmp.ne.s32.totalorder %s941_s20, 0 }
  0x3e   : > { %s861_s11 = sand.u32 (!%p946_p12), 1, %s715_s13   ;;  %p947_p1 = scmp.ne.s32.totalorder (!%p946_p12), %s939_s18, 0 }
  0x3f   : > { %168 = sbr.rel (%p946_p12) target bundleno = 866 (0x362), region = 32  ;;  %s492_s21 = sshll.u32 (!%p946_p12), %s861_s11, 2 }
  0x40   : > { %s171_s26 = scalar_lea.sflag (!%p946_p12), [#allocation3], %s861_s11  ;;  %s174_s27 = scalar_lea.vmem (!%p946_p12), [#allocation2], %s492_s21 }
  0x44   : > { %698 = dma.done.wait (%p947_p1), %s171_s26, 64  }
  0x45   : > { %700 = vsyncadd (%p947_p1), %s171_s26, 4294967232  ;;  %p948_p4 = scmp.eq.s32.totalorder %s775_s16, 0 }
  0x47   : > { %702 = dma.done.wait (%p948_p4), [#allocation6], 256   ;;  %p949_p6 = pmov %p948_p4 }
  0x48   : > { %v729_v0 = vmov 0.0   ;;  %vm730_vm0 = vmmov 0   ;;  %v595_v1 = vld [vmem:[#allocation5 + $0x8] sm:$0xff]   ;;  %v596_v2 = vld [vmem:[#allocation5] sm:$0xff]   ;;  %v202_v3 = vld [vmem:[%s174_s27] sm:$0xf] }
  0x49   : > { %704 = vsyncadd (%p949_p6), [#allocation6], 4294967040  ;;  %512 = vmatprep.subr.bf16.mxu0 %v729_v0  ;;  %516 = vmatprep.mubr.msk.bf16.mxu0 %vm730_vm0, %v729_v0  ;;  %vm226_vm1 = vcmask 261120   ;;  %v495_v4 = vld [vmem:[%s933_s2] ss:$0 sm:$0xff]  ;;  %s731_s17 = smov 96  }
  0x4a   : > { %520 = vmatprep.subr.bf16.mxu1 %v729_v0  ;;  %522 = vmatprep.mubr.msk.bf16.mxu1 %vm730_vm0, %v729_v0  ;;  %s732_s22 = smov 64   ;;  %vm346_vm2 = vcmask 1043456   ;;  %vm320_vm3 = vcmask 64512   ;;  %s494_s23 = sshll.u32 %s861_s11, 3 }
  0x4b   : > { %513 = vmatpush3.bf16.msra.mxu0 %v595_v1  ;;  %s502_s25 = sshll.u32 %s775_s16, 7  ;;  %s200_s28 = scalar_lea.vmem [#allocation7], %s494_s23 }
  0x4c   : > { %514 = vmatprep.subr.bf16.mxu0 %v729_v0  ;;  %s405_s29 = sshll.u32 %s200_s28, 4  ;;  %s887_s8 = scalar_lea.hbm %s934_s3, %s502_s25  ;;  %s889_s29 = int_to_ptr.vmem [resolvable:$true] %s405_s29 }
  0x4d   : > { %s392_s7 = scalar_lea.sflag [#allocation4], %s861_s11  ;;  %s655_s9 = scalar_lea.vmem %s889_s29, 128 }
  0x4e   : > { %p656_p8 = scmp.ne.s32.totalorder %s889_s29, %s655_s9  ;;  %p950_p3 = scmp.ne.s32.totalorder %s944_s6, 0 }
  0x4f   : > { %515 = vmatpush3.bf16.msra.mxu0 %v596_v2  ;;  %s733_s16 = smov [#allocation7]  }
  0x50   : > { %526 = vmatprep.subr.bf16.mxu0 %v729_v0  ;;  %p657_p11 = pnand %p656_p8, %p950_p3  ;;  %s659_s10 = sshll.u32 %s733_s16, 4  ;;  %s660_s10 = int_to_ptr.vmem [resolvable:$false] %s659_s10 }
  0x51   : > { %s661_s21 = scalar_lea.vmem %s660_s10, 256  ;;  %p662_p10 = scmp.lt.s32.totalorder %s889_s29, %s660_s10 }
  0x52   : > { %517 = vmatmul.mubr.msk.bf16.vlgmr.msra.gmra.mxu0 %vm226_vm1, %v202_v3  ;;  %p658_p7 = pneg %p657_p11  ;;  %p663_p2 = scmp.lt.s32.totalorder %s661_s21, %s655_s9 }
  0x53   : > { %528 = vmatprep.mubr.msk.bf16.mxu0 %vm730_vm0, %v729_v0 }
  0x54   : > { %p664_p13 = por %p663_p2, %p662_p10 }
  0x56   : > { %p665_p0 = pnand %p664_p13, %p658_p7 }
 0x112   : > { %v264_v5 = vpop.f32.mrf.mxu0 }
 0x113   : > { %v265_v6 = vadd.f32 %v495_v4, %v264_v5 }
 0x114   : > { %v518_v7 = vpop.f32.mrf.mxu0 }
 0x115   : > { %v270_v8 = vpack.c.bf16 %v265_v6, %v265_v6 }
 0x116   : > { %v267_v9 = vpop.f32.mrf.mxu0 }
 0x117   : > { %272 = vrot.lane.b32.xlu0 %v270_v8, %s731_s17 }
 0x118   : > { %v519_v10 = vpop.f32.mrf.mxu0 }
 0x11b   : > { %341 = vrot.lane.b32.xlu0 %v270_v8, %s732_s22 }
 0x189   : > { %v273_v11 = vpop.permute.xlu0 %272 }
 0x18a   : > { %v278_v12 = vsel %vm226_vm1, %v273_v11, 0 }
 0x18b   : > { %521 = vmatpush3.bf16.xpose.msra.mxu1 %v278_v12 }
 0x18d   : > { %v342_v13 = vpop.permute.xlu0 %341 }
 0x18e   : > { %v348_v14 = vsel %vm346_vm2, %v342_v13, 0 }
 0x18f   : > { %527 = vmatpush3.bf16.msra.mxu0 %v348_v14 }
 0x192   : > { %523 = vmatmul.mubr.msk.bf16.vlgmr.msra.gmra.mxu1 %vm226_vm1, %v270_v8 }
 0x252   : > { %v314_v15 = vpop.f32.mrf.mxu1 }
 0x253   : > { %v321_v16 = vsel %vm320_vm3, %v314_v15, -inf }
 0x254   : > { %v322_v17 = vrot.slane %v321_v16, 4  ;;  %v524_v18 = vpop.f32.mrf.mxu1 }
 0x256   : > { %v323_v19 = vmax.f32 %v321_v16, %v322_v17  ;;  %v317_v20 = vpop.f32.mrf.mxu1 }
 0x258   : > { %v324_v21 = vrot.slane %v323_v19, 2  ;;  %v525_v22 = vpop.f32.mrf.mxu1 }
 0x25a   : > { %v325_v23 = vmax.f32 %v323_v19, %v324_v21 }
 0x25c   : > { %v326_v24 = vrot.slane %v325_v23, 1 }
 0x25e   : > { %v327_v25 = vmax.f32 %v325_v23, %v326_v24 }
 0x260   : > { %v328_v26 = vsub.f32 %v314_v15, %v327_v25 }
 0x262   : > { %v329_v27 = vmul.f32 1.442695, %v328_v26 }
 0x264   : > { %597 = vpow2.f32 %v329_v27 }
 0x271   : > { %v598_v28 = vpop.eup %597 }
 0x272   : > { %v331_v29 = vsel %vm320_vm3, %v598_v28, 0.0 }
 0x273   : > { %v332_v30 = vrot.slane %v331_v29, 4 }
 0x275   : > { %v333_v31 = vadd.f32 %v332_v30, %v331_v29 }
 0x277   : > { %v334_v32 = vrot.slane %v333_v31, 2 }
 0x279   : > { %v335_v33 = vadd.f32 %v334_v32, %v333_v31 }
 0x27b   : > { %v336_v34 = vrot.slane %v335_v33, 1 }
 0x27d   : > { %v337_v35 = vadd.f32 %v336_v34, %v335_v33 }
 0x27f   : > { %599 = vrcp.f32 %v337_v35 }
 0x28c   : > { %v600_v36 = vpop.eup %599 }
 0x28d   : > { %v339_v37 = vmul.f32 %v600_v36, %v598_v28 }
 0x28f   : > { %v340_v38 = vpack.c.bf16 %v339_v37, %v339_v37 }
 0x291   : > { %529 = vmatmul.mubr.msk.bf16.vlgmr.msra.gmra.mxu0 %vm320_vm3, %v340_v38 }
 0x351   : > { %v384_v39 = vpop.f32.mrf.mxu0 }
 0x352   : > { %390 = vst.msk [vmem:[%s200_s28] sm:$0xff] %vm226_vm1, %v384_v39 }
 0x353   : > { %v530_v40 = vpop.f32.mrf.mxu0 }
 0x354   : > { %668 = shalt.err (!%p665_p0)
}
 0x355   : > { %s669_s26 = scalar_lea.hbm %s887_s8, 128  ;;  %s673_s18 = scalar_lea.hbm %s934_s3, 256 }
 0x356   : > { %p670_p5 = scmp.ne.s32.totalorder %s887_s8, %s669_s26  ;;  %p674_p1 = scmp.lt.s32.totalorder %s887_s8, %s934_s3 }
 0x357   : > { %p675_p4 = scmp.lt.s32.totalorder %s673_s18, %s669_s26 }
 0x358   : > { %p671_p9 = pnand %p670_p5, %p950_p3 }
 0x359   : > { %p676_p6 = por %p675_p4, %p674_p1 }
 0x35a   : > { %p672_p12 = pneg %p671_p9 }
 0x35c   : > { %p677_p8 = pnand %p676_p6, %p672_p12 }
 0x35e   : > { %680 = shalt.err (!%p677_p8)
}
 0x35f   : > { %538 = dma.vmem_to_hbm [thread:$0]  (%p950_p3), %s889_s29, 128, %s887_s8, %s392_s7   ;;  %v387_v41 = vpop.f32.mrf.mxu0 }
 0x361   : > { %v531_v42 = vpop.f32.mrf.mxu0 }
 0x362 PF: > { %s417_s22 = sand.u32 1, %s711_s12   ;;  %p951_p11 = scmp.ne.s32.totalorder %s940_s19, 0 }
 0x363   : > { %p952_p7 = scmp.ge.s32.totalorder %s723_s15, 2  ;;  %s418_s23 = scalar_lea.sflag [#allocation4], %s417_s22 }
 0x365   : > { %p549_p10 = pnand %p952_p7, %p951_p11 }
 0x367   : > { %p550_p2 = pneg %p549_p10 }
 0x369   : > { %706 = dma.done.wait (%p550_p2), %s418_s23, 128  }
 0x36a   : > { %708 = vsyncadd (%p550_p2), %s418_s23, 4294967168  ;;  %p17_p3 = scmp.ge.s32.totalorder %s808_s24, 4   ;;  %s953_s12 = smov %s715_s13 }
 0x36b   : > { %s954_s13 = smov %s719_s14  ;;  %s955_s14 = smov %s825_s5 }
 0x36c   : > { %s956_s15 = smov %s808_s24  ;;  %19 = sbr.rel (!%p17_p3) target bundleno = 6 (0x6), region = 81 }
 0x371   :  { %423 = vsyncpa [#allocation3], 1 }
 0x372   :  { %425 = vsyncpa [#allocation3 + $0x1], 1 }
 0x373   :  { %426 = vsyncpa [#allocation6], 1 }
 0x374   :  { %427 = vsyncpa [#allocation4], 1 }
 0x375   :  { %429 = vsyncpa [#allocation4 + $0x1], 1 }

</bundles_post_ra>
